<compile_context>
chip_gen: v6e
topology: v6e:2x2x1
jax: 0.10.0
libtpu: 0.0.40
codegen_flags: <defaults>
</compile_context>

<pallas_src>
import functools

import jax
import jax.numpy as jnp
from jax.experimental import pallas as pl
from jax.experimental.pallas import tpu as pltpu

LANE = 128          # lane width (last dim of every tile)
TM_MAX = 8192       # max rows per block: 8192*128*4B = 4 MiB/block @ f32
CHUNK_ROWS = 512    # inner accumulation chunk (rows)
NCORES = 2          # per-core partials (v7x megacore); serial loop elsewhere


def _round_up(v, m):
    return ((v + m - 1) // m) * m


def _sublane_multiple(dtype):
    # Minimum sublane packing: 8 rows (f32), 16 (bf16/f16), 32 (int8/fp8).
    itemsize = jnp.dtype(dtype).itemsize
    return 8 * max(1, 4 // itemsize)


def _dice_bce_kernel(tiles_per_core, rows_ref, x_ref, t_ref, out_ref):
    """Grid = (core, row_tile).

    out_ref block (1, 3, 8, LANE) holds per-core lane-dense partial sums:
      [0] = sum(x * t)   (dice intersection)
      [1] = sum(x + t)   (dice denominator)
      [2] = sum(-bce)    (negated BCE; sign applied once in the epilogue)
    """
    c = pl.program_id(0)
    i = pl.program_id(1)
    tm, lane = x_ref.shape
    chunk = min(CHUNK_ROWS, tm)
    num_chunks = tm // chunk          # tm % chunk == 0 by construction

    rows_valid = rows_ref[0]
    base_row = (c * tiles_per_core + i) * tm
    needs_mask = base_row + tm > rows_valid

    @pl.when(i == 0)
    def _():
        out_ref[...] = jnp.zeros_like(out_ref)

    def fold_into(acc, v):
        # (r, lane) -> (8, lane) partial sums using only VPU adds (no XLU).
        r = v.shape[0]
        if r % 8 != 0:                 # tiny full-array block only
            v = jnp.concatenate(
                [v, jnp.zeros((8 - r % 8, lane), v.dtype)], axis=0)
            r = v.shape[0]
        return acc + jnp.sum(v.reshape(r // 8, 8, lane), axis=0)

    def accumulate(masked):
        def chunk_stats(ci, carry):
            acc_prod, acc_sum, acc_bce = carry
            if isinstance(ci, int):                 # static single-chunk path
                r0 = ci * chunk
            else:
                r0 = pl.multiple_of(ci * chunk, chunk)
            xv = x_ref[pl.ds(r0, chunk), :].astype(jnp.float32)
            tv = t_ref[pl.ds(r0, chunk), :].astype(jnp.float32)
            if masked:
                # Row-only mask: the prefix is lane-aligned, so whole rows are
                # either fully valid or fully invalid.  Zeroing before the log
                # makes invalid rows contribute exactly 0 to every sum.
                row_ids = jax.lax.broadcasted_iota(jnp.int32, (chunk, lane), 0)
                keep = (base_row + r0 + row_ids) < rows_valid
                xv = jnp.where(keep, xv, 0.0)
                tv = jnp.where(keep, tv, 0.0)
            # Same -100 log clamp as torch.nn.functional.binary_cross_entropy.
            log_x = jnp.maximum(jnp.log(xv), -100.0)
            log_1mx = jnp.maximum(jnp.log(1.0 - xv), -100.0)
            neg_bce = tv * (log_x - log_1mx) + log_1mx      # == -bce(x, t)
            return (fold_into(acc_prod, xv * tv),
                    fold_into(acc_sum, xv + tv),
                    fold_into(acc_bce, neg_bce))

        zeros = jnp.zeros((8, lane), jnp.float32)
        if num_chunks == 1:
            acc_prod, acc_sum, acc_bce = chunk_stats(0, (zeros, zeros, zeros))
        else:
            acc_prod, acc_sum, acc_bce = jax.lax.fori_loop(
                0, num_chunks, chunk_stats, (zeros, zeros, zeros),
                unroll=min(4, num_chunks))
        out_ref[0, 0] += acc_prod
        out_ref[0, 1] += acc_sum
        out_ref[0, 2] += acc_bce

    @pl.when(jnp.logical_not(needs_mask))
    def _():
        accumulate(False)

    @pl.when(needs_mask)
    def _():
        accumulate(True)


def _scalar_stats(x, t):
    """Plain-JAX (intersection, sum(x+t), sum(bce)) for a tiny 1-D slice."""
    x = x.astype(jnp.float32)
    t = t.astype(jnp.float32)
    log_x = jnp.maximum(jnp.log(x), -100.0)
    log_1mx = jnp.maximum(jnp.log(1.0 - x), -100.0)
    bce = -(t * log_x + (1.0 - t) * log_1mx)
    return jnp.sum(x * t), jnp.sum(x + t), jnp.sum(bce)


def dice_bce_loss(inputs, targets, smooth=1.0):
    """Pallas equivalent of DiceBCELoss.forward.  Returns a scalar f32."""
    x = inputs.reshape(-1)
    t = targets.reshape(-1)
    n = x.shape[0]

    rows = n // LANE
    tail = n - rows * LANE

    intersection = jnp.float32(0.0)
    sum_xt = jnp.float32(0.0)
    bce_sum = jnp.float32(0.0)

    if rows > 0:
        # 128-aligned prefix, viewed as (rows, LANE).  No padded copies.
        if tail == 0:
            xp, tp = x.reshape(rows, LANE), t.reshape(rows, LANE)
        else:
            xp = x[: rows * LANE].reshape(rows, LANE)
            tp = t[: rows * LANE].reshape(rows, LANE)

        sub = max(_sublane_multiple(x.dtype), _sublane_multiple(t.dtype))
        rows_per_core = pl.cdiv(rows, NCORES)
        tm = min(TM_MAX, _round_up(rows_per_core, sub))
        if tm > CHUNK_ROWS:
            tm = min(TM_MAX, _round_up(tm, CHUNK_ROWS))
        if tm >= rows:
            tm = rows                       # single full-dim block
        assert tm <= CHUNK_ROWS or tm % CHUNK_ROWS == 0

        num_row_blocks = pl.cdiv(rows, tm)
        tiles_per_core = pl.cdiv(num_row_blocks, NCORES)
        rows_arr = jnp.array([rows], dtype=jnp.int32)

        def in_map(c, i, rows_ref):
            # Clamp so we never request a block past the array; over-hanging
            # logical blocks are fully masked in the kernel.
            return (jnp.minimum(c * tiles_per_core + i, num_row_blocks - 1), 0)

        kernel = functools.partial(_dice_bce_kernel, tiles_per_core)

        partials = pl.pallas_call(
            kernel,
            out_shape=jax.ShapeDtypeStruct((NCORES, 3, 8, LANE), jnp.float32),
            grid_spec=pltpu.PrefetchScalarGridSpec(
                num_scalar_prefetch=1,
                grid=(NCORES, tiles_per_core),
                in_specs=[
                    pl.BlockSpec((tm, LANE), in_map),
                    pl.BlockSpec((tm, LANE), in_map),
                ],
                out_specs=pl.BlockSpec(
                    (1, 3, 8, LANE), lambda c, i, rows_ref: (c, 0, 0, 0)),
            ),
            compiler_params=pltpu.CompilerParams(
                dimension_semantics=("parallel", "arbitrary"),
                vmem_limit_bytes=32 * 1024 * 1024),
        )(rows_arr, xp, tp)

        sums = jnp.sum(partials, axis=(0, 2, 3))       # (3,)
        intersection = intersection + sums[0]
        sum_xt = sum_xt + sums[1]
        bce_sum = bce_sum - sums[2]                    # kernel stores -bce

    if tail > 0:
        it, st, bt = _scalar_stats(x[rows * LANE:], t[rows * LANE:])
        intersection = intersection + it
        sum_xt = sum_xt + st
        bce_sum = bce_sum + bt

    dice_loss = 1.0 - (2.0 * intersection + smooth) / (sum_xt + smooth)
    bce_mean = bce_sum / jnp.float32(n)
    return bce_mean + dice_loss


def _reference(inputs, targets, smooth=1.0):
    x = inputs.reshape(-1).astype(jnp.float32)
    t = targets.reshape(-1).astype(jnp.float32)
    intersection = jnp.sum(x * t)
    dice = 1.0 - (2.0 * intersection + smooth) / (jnp.sum(x) + jnp.sum(t) + smooth)
    log_x = jnp.maximum(jnp.log(x), -100.0)
    log_1mx = jnp.maximum(jnp.log(1.0 - x), -100.0)
    bce = jnp.mean(-(t * log_x + (1.0 - t) * log_1mx))
    return bce + dice


if __name__ == "__main__":
    key = jax.random.PRNGKey(0)

    def make_case(shape, k):
        k1, k2 = jax.random.split(k)
        inp = jax.nn.sigmoid(jax.random.normal(k1, shape, dtype=jnp.float32))
        tgt = (jax.random.uniform(k2, shape) > 0.5).astype(jnp.float32)
        return inp, tgt

    cases = [
        (2, 4, 16, 16),     # lane-aligned (n % 128 == 0), main example
        (3, 5, 11),         # ragged tail (n % 128 != 0) + phantom core block
        (2, 8, 128, 128),   # exercises the chunked fori_loop fast path
    ]
    keys = jax.random.split(key, len(cases))
    for shape, k in zip(cases, keys):
        inputs, targets = make_case(shape, k)
        loss = jax.block_until_ready(dice_bce_loss(inputs, targets, smooth=1.0))
        ref = jax.block_until_ready(_reference(inputs, targets, smooth=1.0))
        assert jnp.allclose(loss, ref, rtol=2e-5, atol=2e-5), (shape, loss, ref)

    print("KERNEL_OK")
</pallas_src>

<mosaic_0001>
module attributes {stable_mosaic.version = 11 : i64} {
  func.func @_dice_bce_kernel(%arg0: i32, %arg1: i32, %arg2: memref<1xi32, #tpu.memory_space<smem>>, %arg3: memref<8x128xf32, #tpu.memory_space<vmem>>, %arg4: memref<8x128xf32, #tpu.memory_space<vmem>>, %arg5: memref<1x3x8x128xf32, #tpu.memory_space<vmem>>) attributes {dimension_semantics = [#tpu.dimension_semantics<parallel>, #tpu.dimension_semantics<arbitrary>], iteration_bounds = array<i64: 2, 1>, scalar_prefetch = 1 : i64, scratch_operands = 0 : i64, tpu.core_type = #tpu.core_type<tc>, window_params = [{transform_indices = @transform_0, window_bounds = array<i64: 8, 128>}, {transform_indices = @transform_1, window_bounds = array<i64: 8, 128>}, {transform_indices = @transform_2, window_bounds = array<i64: 1, 3, 8, 128>}]} {
    %c0 = arith.constant 0 : index
    %0 = memref.load %arg2[%c0] : memref<1xi32, #tpu.memory_space<smem>>
    %c1_i32 = arith.constant 1 : i32
    %1 = arith.muli %arg0, %c1_i32 : i32
    %2 = arith.addi %1, %arg1 : i32
    %c8_i32 = arith.constant 8 : i32
    %3 = arith.muli %2, %c8_i32 : i32
    %c8_i32_0 = arith.constant 8 : i32
    %4 = arith.addi %3, %c8_i32_0 : i32
    %5 = arith.cmpi sgt, %4, %0 : i32
    %c0_i32 = arith.constant 0 : i32
    %6 = arith.cmpi eq, %arg1, %c0_i32 : i32
    %7 = arith.extui %6 : i1 to i32
    %c0_i32_1 = arith.constant 0 : i32
    %8 = arith.cmpi ne, %7, %c0_i32_1 : i32
    scf.if %8 {
      %cst = arith.constant 0.000000e+00 : f32
      %14 = vector.broadcast %cst : f32 to vector<1x3x8x128xf32>
      %c0_4 = arith.constant 0 : index
      %c0_5 = arith.constant 0 : index
      %c0_6 = arith.constant 0 : index
      %c0_7 = arith.constant 0 : index
      %15 = vector.load %arg5[%c0_4, %c0_5, %c0_6, %c0_7] : memref<1x3x8x128xf32, #tpu.memory_space<vmem>>, vector<1x3x8x128xf32>
      tpu.vector_store %arg5[%c0_4, %c0_5, %c0_6, %c0_7], %14 {strides = array<i32>} : memref<1x3x8x128xf32, #tpu.memory_space<vmem>>, vector<1x3x8x128xf32>,
    } else {
    }
    %true = arith.constant true
    %9 = arith.xori %5, %true : i1
    %10 = arith.extui %9 : i1 to i32
    %c0_i32_2 = arith.constant 0 : i32
    %11 = arith.cmpi ne, %10, %c0_i32_2 : i32
    scf.if %11 {
      %cst = arith.constant 0.000000e+00 : f32
      %14 = vector.broadcast %cst : f32 to vector<8x128xf32>
      %c0_4 = arith.constant 0 : index
      %c0_5 = arith.constant 0 : index
      %15 = vector.load %arg3[%c0_4, %c0_5] : memref<8x128xf32, #tpu.memory_space<vmem>>, vector<8x128xf32>
      %c0_6 = arith.constant 0 : index
      %c0_7 = arith.constant 0 : index
      %16 = vector.load %arg4[%c0_6, %c0_7] : memref<8x128xf32, #tpu.memory_space<vmem>>, vector<8x128xf32>
      %17 = math.log %15 : vector<8x128xf32>
      %cst_8 = arith.constant -1.000000e+02 : f32
      %18 = vector.broadcast %cst_8 : f32 to vector<8x128xf32>
      %19 = arith.maximumf %17, %18 : vector<8x128xf32>
      %cst_9 = arith.constant 1.000000e+00 : f32
      %20 = vector.broadcast %cst_9 : f32 to vector<8x128xf32>
      %21 = arith.subf %20, %15 : vector<8x128xf32>
      %22 = math.log %21 : vector<8x128xf32>
      %cst_10 = arith.constant -1.000000e+02 : f32
      %23 = vector.broadcast %cst_10 : f32 to vector<8x128xf32>
      %24 = arith.maximumf %22, %23 : vector<8x128xf32>
      %25 = arith.subf %19, %24 : vector<8x128xf32>
      %26 = arith.mulf %16, %25 : vector<8x128xf32>
      %27 = arith.addf %26, %24 : vector<8x128xf32>
      %28 = arith.mulf %15, %16 : vector<8x128xf32>
      %29 = vector.shape_cast %28 : vector<8x128xf32> to vector<1x8x128xf32>
      %cst_11 = arith.constant dense<0.000000e+00> : vector<8x128xf32>
      %30 = vector.multi_reduction <add>, %29, %cst_11 [0] : vector<1x8x128xf32> to vector<8x128xf32>
      %31 = arith.addf %14, %30 : vector<8x128xf32>
      %32 = arith.addf %15, %16 : vector<8x128xf32>
      %33 = vector.shape_cast %32 : vector<8x128xf32> to vector<1x8x128xf32>
      %cst_12 = arith.constant dense<0.000000e+00> : vector<8x128xf32>
      %34 = vector.multi_reduction <add>, %33, %cst_12 [0] : vector<1x8x128xf32> to vector<8x128xf32>
      %35 = arith.addf %14, %34 : vector<8x128xf32>
      %36 = vector.shape_cast %27 : vector<8x128xf32> to vector<1x8x128xf32>
      %cst_13 = arith.constant dense<0.000000e+00> : vector<8x128xf32>
      %37 = vector.multi_reduction <add>, %36, %cst_13 [0] : vector<1x8x128xf32> to vector<8x128xf32>
      %38 = arith.addf %14, %37 : vector<8x128xf32>
      %c0_14 = arith.constant 0 : index
      %c0_15 = arith.constant 0 : index
      %c0_16 = arith.constant 0 : index
      %c0_17 = arith.constant 0 : index
      %39 = vector.load %arg5[%c0_14, %c0_15, %c0_16, %c0_17] : memref<1x3x8x128xf32, #tpu.memory_space<vmem>>, vector<1x1x8x128xf32>
      %40 = vector.shape_cast %39 : vector<1x1x8x128xf32> to vector<8x128xf32>
      %41 = arith.addf %40, %31 : vector<8x128xf32>
      %c0_18 = arith.constant 0 : index
      %c0_19 = arith.constant 0 : index
      %c0_20 = arith.constant 0 : index
      %c0_21 = arith.constant 0 : index
      %42 = vector.load %arg5[%c0_18, %c0_19, %c0_20, %c0_21] : memref<1x3x8x128xf32, #tpu.memory_space<vmem>>, vector<1x1x8x128xf32>
      %43 = vector.shape_cast %42 : vector<1x1x8x128xf32> to vector<8x128xf32>
      %44 = vector.shape_cast %41 : vector<8x128xf32> to vector<1x1x8x128xf32>
      tpu.vector_store %arg5[%c0_18, %c0_19, %c0_20, %c0_21], %44 {strides = array<i32>} : memref<1x3x8x128xf32, #tpu.memory_space<vmem>>, vector<1x1x8x128xf32>,
      %c0_22 = arith.constant 0 : index
      %c1 = arith.constant 1 : index
      %c0_23 = arith.constant 0 : index
      %c0_24 = arith.constant 0 : index
      %45 = vector.load %arg5[%c0_22, %c1, %c0_23, %c0_24] : memref<1x3x8x128xf32, #tpu.memory_space<vmem>>, vector<1x1x8x128xf32>
      %46 = vector.shape_cast %45 : vector<1x1x8x128xf32> to vector<8x128xf32>
      %47 = arith.addf %46, %35 : vector<8x128xf32>
      %c0_25 = arith.constant 0 : index
      %c1_26 = arith.constant 1 : index
      %c0_27 = arith.constant 0 : index
      %c0_28 = arith.constant 0 : index
      %48 = vector.load %arg5[%c0_25, %c1_26, %c0_27, %c0_28] : memref<1x3x8x128xf32, #tpu.memory_space<vmem>>, vector<1x1x8x128xf32>
      %49 = vector.shape_cast %48 : vector<1x1x8x128xf32> to vector<8x128xf32>
      %50 = vector.shape_cast %47 : vector<8x128xf32> to vector<1x1x8x128xf32>
      tpu.vector_store %arg5[%c0_25, %c1_26, %c0_27, %c0_28], %50 {strides = array<i32>} : memref<1x3x8x128xf32, #tpu.memory_space<vmem>>, vector<1x1x8x128xf32>,
      %c0_29 = arith.constant 0 : index
      %c2 = arith.constant 2 : index
      %c0_30 = arith.constant 0 : index
      %c0_31 = arith.constant 0 : index
      %51 = vector.load %arg5[%c0_29, %c2, %c0_30, %c0_31] : memref<1x3x8x128xf32, #tpu.memory_space<vmem>>, vector<1x1x8x128xf32>
      %52 = vector.shape_cast %51 : vector<1x1x8x128xf32> to vector<8x128xf32>
      %53 = arith.addf %52, %38 : vector<8x128xf32>
      %c0_32 = arith.constant 0 : index
      %c2_33 = arith.constant 2 : index
      %c0_34 = arith.constant 0 : index
      %c0_35 = arith.constant 0 : index
      %54 = vector.load %arg5[%c0_32, %c2_33, %c0_34, %c0_35] : memref<1x3x8x128xf32, #tpu.memory_space<vmem>>, vector<1x1x8x128xf32>
      %55 = vector.shape_cast %54 : vector<1x1x8x128xf32> to vector<8x128xf32>
      %56 = vector.shape_cast %53 : vector<8x128xf32> to vector<1x1x8x128xf32>
      tpu.vector_store %arg5[%c0_32, %c2_33, %c0_34, %c0_35], %56 {strides = array<i32>} : memref<1x3x8x128xf32, #tpu.memory_space<vmem>>, vector<1x1x8x128xf32>,
    } else {
    }
    %12 = arith.extui %5 : i1 to i32
    %c0_i32_3 = arith.constant 0 : i32
    %13 = arith.cmpi ne, %12, %c0_i32_3 : i32
    scf.if %13 {
      %cst = arith.constant 0.000000e+00 : f32
      %14 = vector.broadcast %cst : f32 to vector<8x128xf32>
      %c0_4 = arith.constant 0 : index
      %c0_5 = arith.constant 0 : index
      %15 = vector.load %arg3[%c0_4, %c0_5] : memref<8x128xf32, #tpu.memory_space<vmem>>, vector<8x128xf32>
      %c0_6 = arith.constant 0 : index
      %c0_7 = arith.constant 0 : index
      %16 = vector.load %arg4[%c0_6, %c0_7] : memref<8x128xf32, #tpu.memory_space<vmem>>, vector<8x128xf32>
      %17 = tpu.iota {dimensions = array<i32: 0>} : vector<8x128xi32>
      %c0_i32_8 = arith.constant 0 : i32
      %18 = arith.addi %3, %c0_i32_8 : i32
      %19 = vector.broadcast %18 : i32 to vector<8x128xi32>
      %20 = arith.addi %19, %17 : vector<8x128xi32>
      %21 = vector.broadcast %0 : i32 to vector<8x128xi32>
      %22 = arith.cmpi slt, %20, %21 : vector<8x128xi32>
      %cst_9 = arith.constant 0.000000e+00 : f32
      %23 = vector.broadcast %cst_9 : f32 to vector<8x128xf32>
      %24 = arith.select %22, %15, %23 : vector<8x128xi1>, vector<8x128xf32>
      %cst_10 = arith.constant 0.000000e+00 : f32
      %25 = vector.broadcast %cst_10 : f32 to vector<8x128xf32>
      %26 = arith.select %22, %16, %25 : vector<8x128xi1>, vector<8x128xf32>
      %27 = math.log %24 : vector<8x128xf32>
      %cst_11 = arith.constant -1.000000e+02 : f32
      %28 = vector.broadcast %cst_11 : f32 to vector<8x128xf32>
      %29 = arith.maximumf %27, %28 : vector<8x128xf32>
      %cst_12 = arith.constant 1.000000e+00 : f32
      %30 = vector.broadcast %cst_12 : f32 to vector<8x128xf32>
      %31 = arith.subf %30, %24 : vector<8x128xf32>
      %32 = math.log %31 : vector<8x128xf32>
      %cst_13 = arith.constant -1.000000e+02 : f32
      %33 = vector.broadcast %cst_13 : f32 to vector<8x128xf32>
      %34 = arith.maximumf %32, %33 : vector<8x128xf32>
      %35 = arith.subf %29, %34 : vector<8x128xf32>
      %36 = arith.mulf %26, %35 : vector<8x128xf32>
      %37 = arith.addf %36, %34 : vector<8x128xf32>
      %38 = arith.mulf %24, %26 : vector<8x128xf32>
      %39 = vector.shape_cast %38 : vector<8x128xf32> to vector<1x8x128xf32>
      %cst_14 = arith.constant dense<0.000000e+00> : vector<8x128xf32>
      %40 = vector.multi_reduction <add>, %39, %cst_14 [0] : vector<1x8x128xf32> to vector<8x128xf32>
      %41 = arith.addf %14, %40 : vector<8x128xf32>
      %42 = arith.addf %24, %26 : vector<8x128xf32>
      %43 = vector.shape_cast %42 : vector<8x128xf32> to vector<1x8x128xf32>
      %cst_15 = arith.constant dense<0.000000e+00> : vector<8x128xf32>
      %44 = vector.multi_reduction <add>, %43, %cst_15 [0] : vector<1x8x128xf32> to vector<8x128xf32>
      %45 = arith.addf %14, %44 : vector<8x128xf32>
      %46 = vector.shape_cast %37 : vector<8x128xf32> to vector<1x8x128xf32>
      %cst_16 = arith.constant dense<0.000000e+00> : vector<8x128xf32>
      %47 = vector.multi_reduction <add>, %46, %cst_16 [0] : vector<1x8x128xf32> to vector<8x128xf32>
      %48 = arith.addf %14, %47 : vector<8x128xf32>
      %c0_17 = arith.constant 0 : index
      %c0_18 = arith.constant 0 : index
      %c0_19 = arith.constant 0 : index
      %c0_20 = arith.constant 0 : index
      %49 = vector.load %arg5[%c0_17, %c0_18, %c0_19, %c0_20] : memref<1x3x8x128xf32, #tpu.memory_space<vmem>>, vector<1x1x8x128xf32>
      %50 = vector.shape_cast %49 : vector<1x1x8x128xf32> to vector<8x128xf32>
      %51 = arith.addf %50, %41 : vector<8x128xf32>
      %c0_21 = arith.constant 0 : index
      %c0_22 = arith.constant 0 : index
      %c0_23 = arith.constant 0 : index
      %c0_24 = arith.constant 0 : index
      %52 = vector.load %arg5[%c0_21, %c0_22, %c0_23, %c0_24] : memref<1x3x8x128xf32, #tpu.memory_space<vmem>>, vector<1x1x8x128xf32>
      %53 = vector.shape_cast %52 : vector<1x1x8x128xf32> to vector<8x128xf32>
      %54 = vector.shape_cast %51 : vector<8x128xf32> to vector<1x1x8x128xf32>
      tpu.vector_store %arg5[%c0_21, %c0_22, %c0_23, %c0_24], %54 {strides = array<i32>} : memref<1x3x8x128xf32, #tpu.memory_space<vmem>>, vector<1x1x8x128xf32>,
      %c0_25 = arith.constant 0 : index
      %c1 = arith.constant 1 : index
      %c0_26 = arith.constant 0 : index
      %c0_27 = arith.constant 0 : index
      %55 = vector.load %arg5[%c0_25, %c1, %c0_26, %c0_27] : memref<1x3x8x128xf32, #tpu.memory_space<vmem>>, vector<1x1x8x128xf32>
      %56 = vector.shape_cast %55 : vector<1x1x8x128xf32> to vector<8x128xf32>
      %57 = arith.addf %56, %45 : vector<8x128xf32>
      %c0_28 = arith.constant 0 : index
      %c1_29 = arith.constant 1 : index
      %c0_30 = arith.constant 0 : index
      %c0_31 = arith.constant 0 : index
      %58 = vector.load %arg5[%c0_28, %c1_29, %c0_30, %c0_31] : memref<1x3x8x128xf32, #tpu.memory_space<vmem>>, vector<1x1x8x128xf32>
      %59 = vector.shape_cast %58 : vector<1x1x8x128xf32> to vector<8x128xf32>
      %60 = vector.shape_cast %57 : vector<8x128xf32> to vector<1x1x8x128xf32>
      tpu.vector_store %arg5[%c0_28, %c1_29, %c0_30, %c0_31], %60 {strides = array<i32>} : memref<1x3x8x128xf32, #tpu.memory_space<vmem>>, vector<1x1x8x128xf32>,
      %c0_32 = arith.constant 0 : index
      %c2 = arith.constant 2 : index
      %c0_33 = arith.constant 0 : index
      %c0_34 = arith.constant 0 : index
      %61 = vector.load %arg5[%c0_32, %c2, %c0_33, %c0_34] : memref<1x3x8x128xf32, #tpu.memory_space<vmem>>, vector<1x1x8x128xf32>
      %62 = vector.shape_cast %61 : vector<1x1x8x128xf32> to vector<8x128xf32>
      %63 = arith.addf %62, %48 : vector<8x128xf32>
      %c0_35 = arith.constant 0 : index
      %c2_36 = arith.constant 2 : index
      %c0_37 = arith.constant 0 : index
      %c0_38 = arith.constant 0 : index
      %64 = vector.load %arg5[%c0_35, %c2_36, %c0_37, %c0_38] : memref<1x3x8x128xf32, #tpu.memory_space<vmem>>, vector<1x1x8x128xf32>
      %65 = vector.shape_cast %64 : vector<1x1x8x128xf32> to vector<8x128xf32>
      %66 = vector.shape_cast %63 : vector<8x128xf32> to vector<1x1x8x128xf32>
      tpu.vector_store %arg5[%c0_35, %c2_36, %c0_37, %c0_38], %66 {strides = array<i32>} : memref<1x3x8x128xf32, #tpu.memory_space<vmem>>, vector<1x1x8x128xf32>,
    } else {
    }
    return
  }
  func.func @transform_0(%arg0: i32, %arg1: i32, %arg2: memref<1xi32, #tpu.memory_space<smem>>) -> (i32, i32) {
    %c1_i32 = arith.constant 1 : i32
    %0 = arith.muli %arg0, %c1_i32 : i32
    %1 = arith.addi %0, %arg1 : i32
    %c1_i32_0 = arith.constant 1 : i32
    %2 = arith.minsi %1, %c1_i32_0 : i32
    %c0_i32 = arith.constant 0 : i32
    %c0_i32_1 = arith.constant 0 : i32
    return %2, %c0_i32 : i32, i32
  }
  func.func @transform_1(%arg0: i32, %arg1: i32, %arg2: memref<1xi32, #tpu.memory_space<smem>>) -> (i32, i32) {
    %c1_i32 = arith.constant 1 : i32
    %0 = arith.muli %arg0, %c1_i32 : i32
    %1 = arith.addi %0, %arg1 : i32
    %c1_i32_0 = arith.constant 1 : i32
    %2 = arith.minsi %1, %c1_i32_0 : i32
    %c0_i32 = arith.constant 0 : i32
    %c0_i32_1 = arith.constant 0 : i32
    return %2, %c0_i32 : i32, i32
  }
  func.func @transform_2(%arg0: i32, %arg1: i32, %arg2: memref<1xi32, #tpu.memory_space<smem>>) -> (i32, i32, i32, i32) {
    %c0_i32 = arith.constant 0 : i32
    %c0_i32_0 = arith.constant 0 : i32
    %c0_i32_1 = arith.constant 0 : i32
    %c0_i32_2 = arith.constant 0 : i32
    return %arg0, %c0_i32, %c0_i32_0, %c0_i32_1 : i32, i32, i32, i32
  }
}

</mosaic_0001>

<bundles_post_ra>
// kernel: tpu_custom_call.1
= control target key start
LH: loop header
LB: loop body
LE: loop exit
PB: predicated region body
PF: predicated region fallthrough
CT: control target
= control target key end

     0   :  { %s1016_s0 = inlined_call_operand.<no memory space> [shape: s32[1], index: 0, kind: input, shape index: {}]   ;;  %s1017_s1 = inlined_call_operand.hbm [shape: f32[16,128], index: 1, kind: input, shape index: {}]   ;;  %s1018_s2 = inlined_call_operand.hbm [shape: f32[16,128], index: 2, kind: input, shape index: {}]   ;;  %s1019_s3 = inlined_call_operand.hbm [shape: f32[2,3,8,128], index: 3, kind: output, shape index: {}]  }
   0x1   :  { %1020 = sst [smem:[#allocation13_spill]] %s1017_s1 }
   0x2   :  { %8 = sst [smem:[#allocation3]] %s1016_s0 }
   0x3   :  { %9 = vsyncpa [#allocation5], 0 }
   0x4   :  { %11 = vsyncpa [#allocation5 + $0x1], 0 }
   0x5   :  { %12 = vsyncpa [#allocation8], 0 }
   0x6   :  { %14 = vsyncpa [#allocation8 + $0x1], 0 }
   0x7   :  { %15 = vsyncpa [#allocation6], 0 }
   0x8   :  { %17 = vsyncpa [#allocation6 + $0x1], 0  ;;  %s765_s14 = smov 0   ;;  %s767_s15 = smov 0  }
   0x9   :  { %s769_s16 = smov 0   ;;  %s771_s17 = smov 0  }
   0xa   :  { %s773_s18 = smov 0   ;;  %s775_s19 = smov 0  }
   0xb   :  { %s777_s20 = smov 0   ;;  %s779_s0 = smov 0  }
   0xc   :  { %s781_s21 = smov 0  }
   0xd LB: > { %s441_s22 = sadd.s32 4294967295, %s734_s21   ;;  %s442_s23 = sadd.s32 4294967294, %s734_s21   ;;  %s734_s21 = sphi %s781_s21, %s23_s21   ;;  %s730_s0 = sphi %s779_s0, %s1036_s0   ;;  %s726_s20 = sphi %s777_s20, %s1035_s20   ;;  %s722_s19 = sphi %s775_s19, %s1034_s19   ;;  %s718_s18 = sphi %s773_s18, %s1033_s18   ;;  %s714_s17 = sphi %s771_s17, %s1032_s17   ;;  %s710_s16 = sphi %s769_s16, %s1031_s16   ;;  %s706_s15 = sphi %s767_s15, %s1030_s15   ;;  %s702_s14 = sphi %s765_s14, %s1029_s14  }
   0xe   : > { %s35_s24 = sadd.s32 1, %s730_s0  ;;  %p40_p0 = scmp.lt.s32.totalorder %s730_s0, 1 }
   0xf   : > { %p37_p1 = scmp.ge.s32.totalorder %s35_s24, 2  ;;  %s48_s25 = sadd.s32 1, %s722_s19 }
  0x10   : > { %s814_s26 = scalar_select %p40_p0, %s730_s0, 1 }
  0x11   : > { %s1038_s24 = smov (%p37_p1, %s35_s24), 0  ;;  %p55_p2 = scmp.ne.s32.totalorder %s722_s19, %s718_s18 }
  0x12   : > { %p56_p3 = scmp.eq.s32.totalorder %s734_s21, 0  ;;  %p43_p4 = scmp.lt.s32.totalorder %s1038_s24, 1 }
  0x13   : > { %p61_p5 = scmp.ne.s32.totalorder %s718_s18, %s714_s17  ;;  %p62_p7 = scmp.eq.s32.totalorder %s441_s22, 0 }
  0x14   : > { %p823_p6 = por %p56_p3, %p55_p2  ;;  %s103_s30 = ssub.s32 %s730_s0, %s1038_s24 }
  0x15   : > { %s44_s28 = scalar_select %p43_p4, %s1038_s24, 1 }
  0x16   : > { %p828_p8 = por %p62_p7, %p61_p5  ;;  %p104_p9 = scmp.eq.s32.totalorder %s103_s30, 0 }
  0x17   : > { %s45_s4 = ssub.s32 %s814_s26, %s44_s28  ;;  %s106_s5 = sadd.s32 1, %s710_s16 }
  0x18   : > { %p46_p10 = scmp.eq.s32.totalorder %s45_s4, 0  ;;  %p116_p11 = scmp.ne.s32.totalorder %s710_s16, %s706_s15 }
  0x19   : > { %s837_s6 = scalar_select %p104_p9, %s710_s16, %s106_s5  }
  0x1a   : > { %s840_s7 = scalar_select %p46_p10, %s722_s19, %s48_s25  }
  0x1b   : > { %p117_p12 = scmp.eq.s32.totalorder %s441_s22, 1  ;;  %p122_p13 = scmp.ne.s32.totalorder %s706_s15, %s702_s14 }
  0x1c   : > { %p123_p0 = scmp.eq.s32.totalorder %s442_s23, 1  ;;  %p485_p4 = scmp.lt.s32.totalorder %s734_s21, 2 }
  0x1d   : > { %p846_p1 = por %p117_p12, %p116_p11  ;;  %s857_s10 = sand.u32 1, %s722_s19  }
  0x1e   : > { %p851_p3 = por %p123_p0, %p122_p13  ;;  %s446_s11 = sshll.u32 %s814_s26, 7 }
  0x1f   : > { %s445_s12 = sshll.u32 %s857_s10, 3  ;;  %s1025_s1 = sld [smem:[#allocation13_spill]] }
  0x20   : > { %s147_s23 = scalar_lea.vmem [#allocation4], %s445_s12  ;;  %p866_p5 = pnand %p485_p4, %p823_p6 }
  0x21   : > { %s157_s25 = sshll.u32 %s147_s23, 4  ;;  %p449_p7 = scmp.ge.s32.totalorder %s734_s21, 1  ;;  %s158_s25 = int_to_ptr.vmem [resolvable:$true] %s157_s25 }
  0x22   : > { %p183_p9 = scmp.lt.s32.totalorder %s734_s21, 3  ;;  %s144_s30 = scalar_lea.sflag [#allocation5], %s857_s10 }
  0x23   : > { %p572_p10 = pneg %p866_p5  ;;  %s583_s26 = scalar_lea.vmem %s158_s25, 128 }
  0x24   : > { %p584_p11 = scmp.ne.s32.totalorder %s158_s25, %s583_s26  ;;  %s736_s4 = smov [#allocation4]  }
  0x25   : > { %s155_s22 = scalar_lea.hbm %s1025_s1, %s446_s11  ;;  %s588_s27 = sshll.u32 %s736_s4, 4  ;;  %s589_s27 = int_to_ptr.vmem [resolvable:$false] %s588_s27 }
  0x26   : > { %p586_p12 = pnand %p584_p11, %p572_p10  ;;  %s590_s5 = scalar_lea.vmem %s589_s27, 256 }
  0x27   : > { %p591_p6 = scmp.lt.s32.totalorder %s158_s25, %s589_s27  ;;  %p592_p0 = scmp.lt.s32.totalorder %s590_s5, %s583_s26 }
  0x28   : > { %p587_p13 = pneg %p586_p12 }
  0x29   : > { %p593_p4 = por %p592_p0, %p591_p6 }
  0x2b   : > { %p594_p2 = pnand %p593_p4, %p587_p13 }
  0x2d   : > { %597 = shalt.err (!%p594_p2)
}
  0x2e   : > { %477 = dma.hbm_to_vmem [thread:$0]  (!%p866_p5), %s155_s22, 128, %s158_s25, %s144_s30  }
  0x2f   : > { %p884_p11 = pnand %p449_p7, %p183_p9  ;;  %s176_s26 = scalar_lea.hbm %s1018_s2, %s446_s11 }
  0x30   : > { %s168_s4 = scalar_lea.vmem [#allocation7], %s445_s12  ;;  %s165_s5 = scalar_lea.sflag [#allocation8], %s857_s10 }
  0x31   : > { %s178_s27 = sshll.u32 %s168_s4, 4  ;;  %s737_s22 = smov [#allocation7]   ;;  %s179_s27 = int_to_ptr.vmem [resolvable:$true] %s178_s27 }
  0x32   : > { %s611_s1 = scalar_lea.vmem %s179_s27, 128  ;;  %s616_s25 = sshll.u32 %s737_s22, 4  ;;  %s617_s25 = int_to_ptr.vmem [resolvable:$false] %s616_s25 }
  0x33   : > { %p612_p2 = scmp.ne.s32.totalorder %s179_s27, %s611_s1  ;;  %s618_s30 = scalar_lea.vmem %s617_s25, 256 }
  0x34   : > { %p619_p7 = scmp.lt.s32.totalorder %s179_s27, %s617_s25  ;;  %p620_p9 = scmp.lt.s32.totalorder %s618_s30, %s611_s1 }
  0x35   : > { %p614_p12 = pnand %p612_p2, %p572_p10 }
  0x36   : > { %p621_p6 = por %p620_p9, %p619_p7 }
  0x37   : > { %p615_p13 = pneg %p614_p12 }
  0x39   : > { %p622_p0 = pnand %p621_p6, %p615_p13 }
  0x3b   : > { %625 = shalt.err (!%p622_p0)
}
  0x3c   : > { %480 = dma.hbm_to_vmem [thread:$0]  (!%p866_p5), %s176_s26, 128, %s179_s27, %s165_s5  }
  0x3d   : > { %187 = sbr.rel (%p884_p11) target bundleno = 182 (0xb6), region = 28  ;;  %s189_s10 = sand.u32 (!%p884_p11), 1, %s718_s18  }
  0x3e   : > { %s450_s11 = sshll.u32 (!%p884_p11), %s189_s10, 3  ;;  %s190_s12 = scalar_lea.sflag (!%p884_p11), [#allocation5], %s189_s10 }
  0x3f   : > { %s900_s17 = scalar_lea.vmem (!%p884_p11), [#allocation4], %s450_s11 }
  0x42   : > { %689 = dma.done.wait (%p828_p8), %s190_s12, 128  }
  0x43   : > { %691 = vsyncadd (%p828_p8), %s190_s12, 4294967168  ;;  %s199_s1 = scalar_lea.sflag [#allocation8], %s189_s10  ;;  %s906_s23 = scalar_lea.vmem [#allocation7], %s450_s11 }
  0x44   : > { %693 = dma.done.wait (%p828_p8), %s199_s1, 128  }
  0x45   : > { %695 = vsyncadd (%p828_p8), %s199_s1, 4294967168  ;;  %s225_s28 = sand.u32 1, %s706_s15   ;;  %s452_s13 = sshll.u32 %s726_s20, 3  ;;  %v738_v0 = vmov 0.0  }
  0x46   : > { %s914_s26 = sld [smem:[#allocation3]]  ;;  %s466_s4 = smul.u32 24, %s225_s28 }
  0x47   : > { %s920_s27 = sadd.s32 8, %s452_s13 }
  0x48   : > { %s922_s5 = scalar_lea.vmem [#allocation9], %s466_s4 }
  0x49   : > { %243 = vst [vmem:[%s922_s5] sm:$0xff] %v738_v0  ;;  %244 = vst [vmem:[%s922_s5 + $0x8] sm:$0xff] %v738_v0 }
  0x4a   : > { %245 = vst [vmem:[%s922_s5 + $0x10] sm:$0xff] %v738_v0 }
  0x4c   : > { %p453_p8 = scmp.gt.s32.totalorder %s920_s27, %s914_s26 }
  0x4e   : > { %249 = sbr.rel (%p453_p8) target bundleno = 113 (0x71), region = 44 }
  0x53   : > { %v250_v1 = vld [vmem:[%s900_s17] sm:$0xff]  ;;  %v251_v2 = vld [vmem:[%s906_s23] sm:$0xff]  ;;  %v454_v6 = vld [vmem:[%s922_s5 + $0x8] sm:$0xff] }
  0x54   : > { %v270_v3 = vld [vmem:[%s922_s5] sm:$0xff]  ;;  %562 = vlog2.f32 %v250_v1  ;;  %v262_v4 = vmul.f32 %v251_v2, %v250_v1  ;;  %v265_v5 = vadd.f32 %v251_v2, %v250_v1  ;;  %v255_v7 = vsub.f32 1.0, %v250_v1  ;;  %v456_v18 = vld [vmem:[%s922_s5 + $0x10] sm:$0xff] }
  0x56   : > { %v271_v8 = vadd.f32 %v270_v3, %v262_v4  ;;  %v275_v9 = vadd.f32 %v454_v6, %v265_v5  ;;  %564 = vlog2.f32 %v255_v7 }
  0x58   : > { %272 = vst [vmem:[%s922_s5] sm:$0xff] %v271_v8  ;;  %455 = vst [vmem:[%s922_s5 + $0x8] sm:$0xff] %v275_v9 }
  0x61   : > { %v563_v10 = vpop.eup %562 }
  0x62   : > { %v253_v11 = vmul.f32 0.6931472, %v563_v10 }
  0x63   : > { %v565_v12 = vpop.eup %564 }
  0x64   : > { %v254_v13 = vmax.f32 %v253_v11, -100.0  ;;  %v257_v14 = vmul.f32 0.6931472, %v565_v12 }
  0x66   : > { %v258_v15 = vmax.f32 %v257_v14, -100.0 }
  0x68   : > { %v259_v16 = vsub.f32 %v254_v13, %v258_v15 }
  0x6a   : > { %v260_v17 = vmul.f32 %v259_v16, %v251_v2 }
  0x6c   : > { %v261_v19 = vadd.f32 %v260_v17, %v258_v15 }
  0x6e   : > { %v279_v20 = vadd.f32 %v456_v18, %v261_v19 }
  0x70   : > { %457 = vst [vmem:[%s922_s5 + $0x10] sm:$0xff] %v279_v20 }
  0x71 PF: > { %p458_p5 = scmp.le.s32.totalorder %s920_s27, %s914_s26 }
  0x73   : > { %283 = sbr.rel (%p458_p5) target bundleno = 157 (0x9d), region = 48 }
  0x78   : > { %v286_v21 = vlaneseq  ;;  %v288_v22 = vstv %s452_s13  ;;  %v290_v24 = vstv %s914_s26  ;;  %v284_v25 = vld [vmem:[%s900_s17] sm:$0xff]  ;;  %v285_v26 = vld [vmem:[%s906_s23] sm:$0xff] }
  0x79   : > { %v312_v30 = vld [vmem:[%s922_s5] sm:$0xff]  ;;  %v459_v31 = vld [vmem:[%s922_s5 + $0x8] sm:$0xff]  ;;  %v461_v45 = vld [vmem:[%s922_s5 + $0x10] sm:$0xff] }
  0x7a   : > { %v287_v23 = vshrl.u32 %v286_v21, 7 }
  0x7c   : > { %v289_v27 = vadd.s32 %v288_v22, %v287_v23 }
  0x7e   : > { %vm291_vm0 = vcmp.lt.s32.totalorder %v289_v27, %v290_v24 }
  0x7f   : > { %v292_v28 = vsel %vm291_vm0, %v284_v25, 0.0  ;;  %v293_v29 = vsel %vm291_vm0, %v285_v26, 0.0 }
  0x80   : > { %566 = vlog2.f32 %v292_v28  ;;  %v304_v32 = vmul.f32 %v293_v29, %v292_v28  ;;  %v307_v33 = vadd.f32 %v293_v29, %v292_v28  ;;  %v297_v34 = vsub.f32 1.0, %v292_v28 }
  0x82   : > { %v313_v35 = vadd.f32 %v312_v30, %v304_v32  ;;  %v317_v36 = vadd.f32 %v459_v31, %v307_v33  ;;  %568 = vlog2.f32 %v297_v34 }
  0x84   : > { %314 = vst [vmem:[%s922_s5] sm:$0xff] %v313_v35  ;;  %460 = vst [vmem:[%s922_s5 + $0x8] sm:$0xff] %v317_v36 }
  0x8d   : > { %v567_v37 = vpop.eup %566 }
  0x8e   : > { %v295_v38 = vmul.f32 0.6931472, %v567_v37 }
  0x8f   : > { %v569_v39 = vpop.eup %568 }
  0x90   : > { %v296_v40 = vmax.f32 %v295_v38, -100.0  ;;  %v299_v41 = vmul.f32 0.6931472, %v569_v39 }
  0x92   : > { %v300_v42 = vmax.f32 %v299_v41, -100.0 }
  0x94   : > { %v301_v43 = vsub.f32 %v296_v40, %v300_v42 }
  0x96   : > { %v302_v44 = vmul.f32 %v301_v43, %v293_v29 }
  0x98   : > { %v303_v46 = vadd.f32 %v302_v44, %v300_v42 }
  0x9a   : > { %v321_v47 = vadd.f32 %v461_v45, %v303_v46 }
  0x9c   : > { %462 = vst [vmem:[%s922_s5 + $0x10] sm:$0xff] %v321_v47 }
  0x9d PF: > { %s467_s29 = smul.u32 384, %s726_s20  ;;  %s337_s22 = sshll.u32 %s922_s5, 4  ;;  %s957_s22 = int_to_ptr.vmem [resolvable:$true] %s337_s22 }
  0x9e   : > { %s961_s11 = scalar_lea.sflag [#allocation6], %s225_s28  ;;  %s626_s12 = scalar_lea.vmem %s957_s22, 384 }
  0x9f   : > { %s955_s10 = scalar_lea.hbm %s1019_s3, %s467_s29  ;;  %p627_p10 = scmp.ne.s32.totalorder %s957_s22, %s626_s12 }
  0xa0   : > { %s739_s20 = smov [#allocation9]  }
  0xa1   : > { %p628_p4 = pnand %p627_p10, %p846_p1  ;;  %s630_s17 = sshll.u32 %s739_s20, 4  ;;  %s631_s17 = int_to_ptr.vmem [resolvable:$false] %s630_s17 }
  0xa2   : > { %s632_s1 = scalar_lea.vmem %s631_s17, 768  ;;  %p633_p2 = scmp.lt.s32.totalorder %s957_s22, %s631_s17 }
  0xa3   : > { %p629_p11 = pneg %p628_p4  ;;  %p634_p12 = scmp.lt.s32.totalorder %s632_s1, %s626_s12 }
  0xa5   : > { %p635_p13 = por %p634_p12, %p633_p2 }
  0xa7   : > { %p636_p7 = pnand %p635_p13, %p629_p11 }
  0xa9   : > { %639 = shalt.err (!%p636_p7)
}
  0xaa   : > { %s640_s23 = scalar_lea.hbm %s955_s10, 384  ;;  %s644_s26 = scalar_lea.hbm %s1019_s3, 768 }
  0xab   : > { %p641_p9 = scmp.ne.s32.totalorder %s955_s10, %s640_s23  ;;  %p645_p8 = scmp.lt.s32.totalorder %s955_s10, %s1019_s3 }
  0xac   : > { %p646_p5 = scmp.lt.s32.totalorder %s644_s26, %s640_s23 }
  0xad   : > { %p642_p6 = pnand %p641_p9, %p846_p1 }
  0xae   : > { %p647_p10 = por %p646_p5, %p645_p8 }
  0xaf   : > { %p643_p0 = pneg %p642_p6 }
  0xb1   : > { %p648_p4 = pnand %p647_p10, %p643_p0 }
  0xb3   : > { %651 = shalt.err (!%p648_p4)
}
  0xb4   : > { %s740_s5 = smov 128   ;;  %s741_s29 = smov 8  }
  0xb5   : > { %472 = dma.vmem_to_hbm [thread:$0]  (%p846_p1), %s957_s22, 384, %s955_s10, %s961_s11, %s740_s5, %s740_s5, %s741_s29  }
  0xb6 PF: > { %s352_s25 = sand.u32 1, %s702_s14   ;;  %p1028_p11 = scmp.ge.s32.totalorder %s734_s21, 2 }
  0xb7   : > { %s353_s30 = scalar_lea.sflag [#allocation6], %s352_s25 }
  0xb8   : > { %p482_p2 = pnand %p1028_p11, %p851_p3 }
  0xba   : > { %p483_p12 = pneg %p482_p2 }
  0xbc   : > { %697 = dma.done.wait (%p483_p12), %s353_s30, 384  }
  0xbd   : > { %699 = vsyncadd (%p483_p12), %s353_s30, 4294966912  ;;  %s23_s21 = sadd.s32 1, %s734_s21   ;;  %s1029_s14 = smov %s706_s15 }
  0xbe   : > { %p20_p13 = scmp.ge.s32.totalorder %s23_s21, 4   ;;  %s1030_s15 = smov %s710_s16 }
  0xbf   : > { %s1031_s16 = smov %s837_s6  ;;  %s1032_s17 = smov %s718_s18 }
  0xc0   : > { %s1033_s18 = smov %s722_s19  ;;  %s1034_s19 = smov %s840_s7 }
  0xc1   : > { %s1035_s20 = smov %s730_s0  ;;  %s1036_s0 = smov %s1038_s24 }
  0xc2   :  { %22 = sbr.rel (!%p20_p13) target bundleno = 13 (0xd), region = 102 }
  0xc7   :  { %358 = vsyncpa [#allocation5], 1 }
  0xc8   :  { %360 = vsyncpa [#allocation5 + $0x1], 1 }
  0xc9   :  { %361 = vsyncpa [#allocation8], 1 }
  0xca   :  { %363 = vsyncpa [#allocation8 + $0x1], 1 }
  0xcb   :  { %364 = vsyncpa [#allocation6], 1 }
  0xcc   :  { %366 = vsyncpa [#allocation6 + $0x1], 1 }

</bundles_post_ra>
